<compile_context>
chip_gen: v7x
topology: tpu7x:2x2x1
jax: 0.10.0
libtpu: 0.0.40
codegen_flags: <defaults>
</compile_context>

<pallas_src>
import jax
import jax.numpy as jnp
from jax.experimental import pallas as pl
from jax.experimental.pallas import tpu as pltpu


def _normalize_kernel(x_ref, scale_ref, shift_ref, o_ref):
    """o = x * scale + shift   (single full-block FMA on the VPU)

    x_ref     : VMEM, (tile_r, HW)  input dtype
    scale_ref : VMEM, (tile_r, 1)   float32  (= rsqrt(var + eps) per row)
    shift_ref : VMEM, (tile_r, 1)   float32  (= -mean * scale per row)
    o_ref     : VMEM, (tile_r, HW)  input dtype
    """
    x = x_ref[...].astype(jnp.float32)
    o_ref[...] = (x * scale_ref[...] + shift_ref[...]).astype(o_ref.dtype)


def transformer_forward(x_nchw, mean_c, var_c, eps=1e-8):
    """Apply the per-channel normalization transform with a Pallas kernel.

    x_nchw : [N, C, H, W]
    mean_c : [C]  (the `{name}_mean` attribute installed by setUp)
    var_c  : [C]  (the `{name}_var`  attribute installed by setUp)
    returns: [N, C, H, W], same dtype as x_nchw
    """
    N, C, H, W = x_nchw.shape
    rows, hw = N * C, H * W

    # Lane/sublane-dense 2D slab: rows = N*C sublanes, hw lanes.
    x_flat = x_nchw.reshape(rows, hw)

    # Fold (x - mean) * rsqrt(var + eps) into a single scale/shift FMA.
    scale_c = jax.lax.rsqrt(var_c.astype(jnp.float32) + jnp.float32(eps))
    shift_c = -mean_c.astype(jnp.float32) * scale_c
    # Per-row vectors (channel pattern repeats across the batch): [rows, 1].
    scale_r = jnp.tile(scale_c, N).reshape(rows, 1)
    shift_r = jnp.tile(shift_c, N).reshape(rows, 1)

    # Row tiling: biggest tile that comfortably fits double-buffered in+out in
    # scoped VMEM on all generations (v7x: 64 MiB physical / 32 MiB scoped).
    MAX_TILE_R = 1024  # 1024 rows x hw lanes; e.g. hw=1024 f32 -> 4 MiB/tile.
    tile_r = rows if rows <= MAX_TILE_R else MAX_TILE_R
    grid = (pl.cdiv(rows, tile_r),)

    out_flat = pl.pallas_call(
        _normalize_kernel,
        out_shape=jax.ShapeDtypeStruct((rows, hw), x_flat.dtype),
        grid=grid,
        in_specs=[
            pl.BlockSpec((tile_r, hw), lambda i: (i, 0)),  # x
            pl.BlockSpec((tile_r, 1), lambda i: (i, 0)),   # scale
            pl.BlockSpec((tile_r, 1), lambda i: (i, 0)),   # shift
        ],
        out_specs=pl.BlockSpec((tile_r, hw), lambda i: (i, 0)),
        compiler_params=pltpu.CompilerParams(
            dimension_semantics=("parallel",),   # shard rows across TCs on v7x
            vmem_limit_bytes=32 * 1024 * 1024,
        ),
    )(x_flat, scale_r, shift_r)

    return out_flat.reshape(N, C, H, W)


def setup_statistics(dataset_nchw):
    """Emulates Transformer.setUp(): per-channel mean/var over a dataset.

    (Plain-JAX glue; parameter setup, not the hot path.)
    """
    mean = jnp.mean(dataset_nchw, axis=(0, 2, 3))
    var = jnp.var(dataset_nchw, axis=(0, 2, 3))
    return mean, var


if __name__ == "__main__":
    key = jax.random.PRNGKey(0)
    k_data, k_x = jax.random.split(key)

    N, C, H, W = 2, 4, 16, 16

    # Deterministic synthetic "dataset" used by setUp() to derive statistics.
    dataset = jax.random.normal(k_data, (8, C, H, W), dtype=jnp.float32) * 3.0 + 1.5
    mean_c, var_c = setup_statistics(dataset)

    # Input to forward().
    x = jax.random.normal(k_x, (N, C, H, W), dtype=jnp.float32) * 2.0 + 0.5

    y = transformer_forward(x, mean_c, var_c)
    y = jax.block_until_ready(y)

    # Reference check (pure JAX).
    ref = (x - mean_c[None, :, None, None]) * jax.lax.rsqrt(
        var_c[None, :, None, None] + jnp.float32(1e-8)
    )
    assert y.shape == (N, C, H, W)
    assert y.dtype == x.dtype
    assert jnp.allclose(y, ref, atol=1e-5, rtol=1e-5)

    print("KERNEL_OK")
</pallas_src>

<mosaic_0001>
module attributes {stable_mosaic.version = 11 : i64} {
  func.func @_normalize_kernel(%arg0: i32, %arg1: memref<8x256xf32, #tpu.memory_space<vmem>>, %arg2: memref<8x1xf32, #tpu.memory_space<vmem>>, %arg3: memref<8x1xf32, #tpu.memory_space<vmem>>, %arg4: memref<8x256xf32, #tpu.memory_space<vmem>>) attributes {dimension_semantics = [#tpu.dimension_semantics<parallel>], iteration_bounds = array<i64: 1>, scalar_prefetch = 0 : i64, scratch_operands = 0 : i64, tpu.core_type = #tpu.core_type<tc>, window_params = [{transform_indices = @transform_0, window_bounds = array<i64: 8, 256>}, {transform_indices = @transform_1, window_bounds = array<i64: 8, 1>}, {transform_indices = @transform_2, window_bounds = array<i64: 8, 1>}, {transform_indices = @transform_3, window_bounds = array<i64: 8, 256>}]} {
    %c0 = arith.constant 0 : index
    %c0_0 = arith.constant 0 : index
    %0 = vector.load %arg1[%c0, %c0_0] : memref<8x256xf32, #tpu.memory_space<vmem>>, vector<8x256xf32>
    %c0_1 = arith.constant 0 : index
    %c0_2 = arith.constant 0 : index
    %1 = vector.load %arg2[%c0_1, %c0_2] : memref<8x1xf32, #tpu.memory_space<vmem>>, vector<8x1xf32>
    %2 = vector.broadcast %1 : vector<8x1xf32> to vector<8x256xf32>
    %3 = arith.mulf %0, %2 : vector<8x256xf32>
    %c0_3 = arith.constant 0 : index
    %c0_4 = arith.constant 0 : index
    %4 = vector.load %arg3[%c0_3, %c0_4] : memref<8x1xf32, #tpu.memory_space<vmem>>, vector<8x1xf32>
    %5 = vector.broadcast %4 : vector<8x1xf32> to vector<8x256xf32>
    %6 = arith.addf %3, %5 : vector<8x256xf32>
    %c0_5 = arith.constant 0 : index
    %c0_6 = arith.constant 0 : index
    %7 = vector.load %arg4[%c0_5, %c0_6] : memref<8x256xf32, #tpu.memory_space<vmem>>, vector<8x256xf32>
    tpu.vector_store %arg4[%c0_5, %c0_6], %6 {strides = array<i32>} : memref<8x256xf32, #tpu.memory_space<vmem>>, vector<8x256xf32>,
    return
  }
  func.func @transform_0(%arg0: i32) -> (i32, i32) {
    %c0_i32 = arith.constant 0 : i32
    %c0_i32_0 = arith.constant 0 : i32
    return %arg0, %c0_i32 : i32, i32
  }
  func.func @transform_1(%arg0: i32) -> (i32, i32) {
    %c0_i32 = arith.constant 0 : i32
    %c0_i32_0 = arith.constant 0 : i32
    return %arg0, %c0_i32 : i32, i32
  }
  func.func @transform_2(%arg0: i32) -> (i32, i32) {
    %c0_i32 = arith.constant 0 : i32
    %c0_i32_0 = arith.constant 0 : i32
    return %arg0, %c0_i32 : i32, i32
  }
  func.func @transform_3(%arg0: i32) -> (i32, i32) {
    %c0_i32 = arith.constant 0 : i32
    %c0_i32_0 = arith.constant 0 : i32
    return %arg0, %c0_i32 : i32, i32
  }
}

</mosaic_0001>

<bundles_post_ra>
// kernel: tpu_custom_call.1
= control target key start
LH: loop header
LB: loop body
LE: loop exit
PB: predicated region body
PF: predicated region fallthrough
CT: control target
= control target key end

     0   :  { %s122_s0 = inlined_call_operand.vmem [shape: f32[8,256], index: 0, kind: input, shape index: {}]   ;;  %s123_s1 = inlined_call_operand.vmem [shape: f32[8,1], index: 1, kind: input, shape index: {}]   ;;  %s124_s2 = inlined_call_operand.vmem [shape: f32[8,1], index: 2, kind: input, shape index: {}]   ;;  %s125_s3 = inlined_call_operand.hbm [shape: f32[8,256], index: 3, kind: output, shape index: {}]  }
   0x1   :  { %v17_v0 = vld [vmem:[%s123_s1] sm:$0xff] }
   0x2   :  { %8 = vsyncpa [#allocation3], 0  ;;  %v76_v1 = vmov 0   ;;  %v25_v2 = vld [vmem:[%s124_s2] sm:$0xff]  ;;  %v16_v5 = vld [vmem:[%s122_s0 + $0x8] sm:$0xff]  ;;  %s77_s20 = smov [#allocation2]  }
   0x3   :  { %51 = vset.pattern.permute.xlu0 %v76_v1  ;;  %v15_v4 = vld [vmem:[%s122_s0] sm:$0xff]  ;;  %s41_s1 = sshll.u32 %s77_s20, 4  ;;  %s42_s1 = int_to_ptr.vmem [resolvable:$true] %s41_s1 }
   0x4   :  { %20 = vperm.xlu0 %51, %v17_v0   ;;  %s52_s2 = scalar_lea.vmem %s42_s1, 256  ;;  %p57_p1 = scmp.lt.s32.totalorder %s42_s1, %s42_s1 }
   0x5   :  { %p53_p0 = scmp.ne.s32.totalorder %s42_s1, %s52_s2  ;;  %p58_p2 = scmp.lt.s32.totalorder %s52_s2, %s52_s2 }
   0x7   :  { %p59_p3 = por %p58_p2, %p57_p1 }
   0x8   :  { %28 = vperm.xlu0 %51, %v25_v2  }
   0x9   :  { %p60_p4 = pnand %p59_p3, %p53_p0 }
  0x83   :  { %v21_v3 = vpop.permute.xlu0 %20 }
  0x84   :  { %v23_v6 = vmul.f32 %v21_v3, %v15_v4  ;;  %v24_v7 = vmul.f32 %v21_v3, %v16_v5 }
  0x87   :  { %v29_v8 = vpop.permute.xlu0 %28 }
  0x88   :  { %v31_v9 = vadd.f32 %v29_v8, %v23_v6  ;;  %v32_v10 = vadd.f32 %v29_v8, %v24_v7 }
  0x8a   :  { %33 = vst [vmem:[#allocation2] sm:$0xff] %v31_v9  ;;  %34 = vst [vmem:[#allocation2 + $0x8] sm:$0xff] %v32_v10 }
  0x8b   :  { %63 = shalt.err (!%p60_p4)
}
  0x8c   :  { %s64_s0 = scalar_lea.hbm %s125_s3, 256 }
  0x8d   :  { %p65_p5 = scmp.ne.s32.totalorder %s125_s3, %s64_s0  ;;  %p68_p6 = scmp.lt.u32.totalorder %s64_s0, %s125_s3 }
  0x8f   :  { %p70_p7 = pnand %p68_p6, %p65_p5 }
  0x91   :  { %73 = shalt.err (!%p70_p7)
}
  0x92   :  { %44 = dma.vmem_to_hbm [thread:$0]  %s42_s1, 256, %s125_s3, [#allocation3]  }
  0x93   :  { %74 = dma.done.wait [#allocation3], 256  }
  0x94   :  { %75 = vsyncadd [#allocation3], 4294967040 }
  0x95   :  { %48 = vsyncpa [#allocation3], 1 }

</bundles_post_ra>
